<compile_context>
chip_gen: v7x
topology: tpu7x:2x2x1
jax: 0.10.0
libtpu: 0.0.40
codegen_flags: <defaults>
</compile_context>

<pallas_src>
import functools

import jax
import jax.numpy as jnp
from jax.experimental import pallas as pl
from jax.experimental.pallas import tpu as pltpu


_LANES = 512          # lane-dense last dim (multiple of 128)
_TM_MAX = 512         # max rows per tile: 512*512*4B = 1 MiB per input tile
_NC = 2               # leading grid axis; parallel across TCs on v7x


def _cdiv(a, b):
    return -(-a // b)


def _round_up(a, b):
    return _cdiv(a, b) * b


def _bce_sum_kernel(recon_ref, x_ref, out_ref):
    """Accumulate BCE partial sums into an (8, L) vreg-shaped accumulator."""
    i = pl.program_id(1)

    p = recon_ref[...].astype(jnp.float32)
    t = x_ref[...].astype(jnp.float32)

    # PyTorch's binary_cross_entropy clamps each log term at -100.
    log_p = jnp.maximum(jnp.log(p), -100.0)
    log_1mp = jnp.maximum(jnp.log(1.0 - p), -100.0)
    # -(t*log_p + (1-t)*log_1mp) == -(t*(log_p - log_1mp) + log_1mp)
    loss = -(t * (log_p - log_1mp) + log_1mp)          # (tm, L)

    tm, lanes = loss.shape
    # Pure view (splits the major dim only); sum(axis=0) is vreg-wise VPU adds.
    partial = loss.reshape(tm // 8, 8, lanes).sum(axis=0)   # (8, L)

    @pl.when(i == 0)
    def _():
        out_ref[...] = jnp.zeros_like(out_ref)

    out_ref[0] += partial


@jax.jit
def ae_loss(recon_x, x):
    """BCE(recon_x, x.view(-1, 784), reduction='sum') -> scalar float32."""
    recon_flat = recon_x.reshape(-1)
    x_flat = x.reshape(-1)
    assert recon_flat.size == x_flat.size, "recon_x and x must match elementwise"

    total = recon_flat.size
    lanes = _LANES

    rows = _cdiv(total, lanes)
    rows_per_core = _cdiv(rows, _NC)
    tm = min(_TM_MAX, _round_up(rows_per_core, 8))
    nt = _cdiv(rows_per_core, tm)
    rows_padded = _NC * nt * tm
    padded_total = rows_padded * lanes

    pad = padded_total - total
    if pad:
        # p = 1, t = 1 contributes exactly 0 loss under the -100 clamp.
        recon_flat = jnp.concatenate(
            [recon_flat, jnp.ones((pad,), recon_flat.dtype)])
        x_flat = jnp.concatenate([x_flat, jnp.ones((pad,), x_flat.dtype)])

    recon_2d = recon_flat.reshape(rows_padded, lanes)
    x_2d = x_flat.reshape(rows_padded, lanes)

    bytes_accessed = (recon_2d.size * recon_2d.dtype.itemsize
                      + x_2d.size * x_2d.dtype.itemsize
                      + _NC * 8 * lanes * 4)

    out = pl.pallas_call(
        _bce_sum_kernel,
        out_shape=jax.ShapeDtypeStruct((_NC, 8, lanes), jnp.float32),
        grid_spec=pltpu.PrefetchScalarGridSpec(
            num_scalar_prefetch=0,
            grid=(_NC, nt),
            in_specs=[
                pl.BlockSpec((tm, lanes), lambda c, i: (c * nt + i, 0)),
                pl.BlockSpec((tm, lanes), lambda c, i: (c * nt + i, 0)),
            ],
            out_specs=pl.BlockSpec((1, 8, lanes), lambda c, i: (c, 0, 0)),
        ),
        compiler_params=pltpu.CompilerParams(
            dimension_semantics=("parallel", "arbitrary"),
        ),
        cost_estimate=pl.CostEstimate(
            flops=6 * padded_total,
            transcendentals=2 * padded_total,
            bytes_accessed=bytes_accessed,
        ),
    )(recon_2d, x_2d)

    # Final tiny reduce of the (NC, 8, L) per-core partials.
    return jnp.sum(out)


def _reference_bce_sum(recon_x, x):
    p = recon_x.reshape(-1, 784).astype(jnp.float32)
    t = x.reshape(-1, 784).astype(jnp.float32)
    log_p = jnp.maximum(jnp.log(p), -100.0)
    log_1mp = jnp.maximum(jnp.log(1.0 - p), -100.0)
    return jnp.sum(-(t * log_p + (1.0 - t) * log_1mp))


if __name__ == "__main__":
    key = jax.random.PRNGKey(0)
    k1, k2 = jax.random.split(key)

    batch = 2
    # x: MNIST-like NCHW image batch; recon_x: decoder output in (0, 1).
    x = jax.random.uniform(k1, (batch, 1, 28, 28), dtype=jnp.float32)
    recon_x = jax.nn.sigmoid(
        jax.random.normal(k2, (batch, 784), dtype=jnp.float32)
    )

    loss = jax.block_until_ready(ae_loss(recon_x, x))
    ref = jax.block_until_ready(_reference_bce_sum(recon_x, x))
    assert jnp.allclose(loss, ref, rtol=1e-4, atol=1e-2), (loss, ref)

    print("KERNEL_OK")
</pallas_src>

<mosaic_0001>
module attributes {stable_mosaic.version = 11 : i64} {
  func.func @_bce_sum_kernel(%arg0: i32, %arg1: i32, %arg2: memref<8x512xf32, #tpu.memory_space<vmem>>, %arg3: memref<8x512xf32, #tpu.memory_space<vmem>>, %arg4: memref<1x8x512xf32, #tpu.memory_space<vmem>>) attributes {dimension_semantics = [#tpu.dimension_semantics<parallel>, #tpu.dimension_semantics<arbitrary>], iteration_bounds = array<i64: 2, 1>, scalar_prefetch = 0 : i64, scratch_operands = 0 : i64, tpu.core_type = #tpu.core_type<tc>, window_params = [{transform_indices = @transform_0, window_bounds = array<i64: 8, 512>}, {transform_indices = @transform_1, window_bounds = array<i64: 8, 512>}, {transform_indices = @transform_2, window_bounds = array<i64: 1, 8, 512>}]} {
    %c0 = arith.constant 0 : index
    %c0_0 = arith.constant 0 : index
    %0 = vector.load %arg2[%c0, %c0_0] : memref<8x512xf32, #tpu.memory_space<vmem>>, vector<8x512xf32>
    %c0_1 = arith.constant 0 : index
    %c0_2 = arith.constant 0 : index
    %1 = vector.load %arg3[%c0_1, %c0_2] : memref<8x512xf32, #tpu.memory_space<vmem>>, vector<8x512xf32>
    %2 = math.log %0 : vector<8x512xf32>
    %cst = arith.constant -1.000000e+02 : f32
    %3 = vector.broadcast %cst : f32 to vector<8x512xf32>
    %4 = arith.maximumf %2, %3 : vector<8x512xf32>
    %cst_3 = arith.constant 1.000000e+00 : f32
    %5 = vector.broadcast %cst_3 : f32 to vector<8x512xf32>
    %6 = arith.subf %5, %0 : vector<8x512xf32>
    %7 = math.log %6 : vector<8x512xf32>
    %cst_4 = arith.constant -1.000000e+02 : f32
    %8 = vector.broadcast %cst_4 : f32 to vector<8x512xf32>
    %9 = arith.maximumf %7, %8 : vector<8x512xf32>
    %10 = arith.subf %4, %9 : vector<8x512xf32>
    %11 = arith.mulf %1, %10 : vector<8x512xf32>
    %12 = arith.addf %11, %9 : vector<8x512xf32>
    %cst_5 = arith.constant 0.000000e+00 : f32
    %13 = vector.broadcast %cst_5 : f32 to vector<8x512xf32>
    %14 = arith.subf %13, %12 : vector<8x512xf32>
    %15 = vector.shape_cast %14 : vector<8x512xf32> to vector<1x8x512xf32>
    %cst_6 = arith.constant dense<0.000000e+00> : vector<8x512xf32>
    %16 = vector.multi_reduction <add>, %15, %cst_6 [0] : vector<1x8x512xf32> to vector<8x512xf32>
    %c0_i32 = arith.constant 0 : i32
    %17 = arith.cmpi eq, %arg1, %c0_i32 : i32
    %18 = arith.extui %17 : i1 to i32
    %c0_i32_7 = arith.constant 0 : i32
    %19 = arith.cmpi ne, %18, %c0_i32_7 : i32
    scf.if %19 {
      %cst_14 = arith.constant 0.000000e+00 : f32
      %26 = vector.broadcast %cst_14 : f32 to vector<1x8x512xf32>
      %c0_15 = arith.constant 0 : index
      %c0_16 = arith.constant 0 : index
      %c0_17 = arith.constant 0 : index
      %27 = vector.load %arg4[%c0_15, %c0_16, %c0_17] : memref<1x8x512xf32, #tpu.memory_space<vmem>>, vector<1x8x512xf32>
      tpu.vector_store %arg4[%c0_15, %c0_16, %c0_17], %26 {strides = array<i32>} : memref<1x8x512xf32, #tpu.memory_space<vmem>>, vector<1x8x512xf32>,
    } else {
    }
    %c0_8 = arith.constant 0 : index
    %c0_9 = arith.constant 0 : index
    %c0_10 = arith.constant 0 : index
    %20 = vector.load %arg4[%c0_8, %c0_9, %c0_10] : memref<1x8x512xf32, #tpu.memory_space<vmem>>, vector<1x8x512xf32>
    %21 = vector.shape_cast %20 : vector<1x8x512xf32> to vector<8x512xf32>
    %22 = arith.addf %21, %16 : vector<8x512xf32>
    %c0_11 = arith.constant 0 : index
    %c0_12 = arith.constant 0 : index
    %c0_13 = arith.constant 0 : index
    %23 = vector.load %arg4[%c0_11, %c0_12, %c0_13] : memref<1x8x512xf32, #tpu.memory_space<vmem>>, vector<1x8x512xf32>
    %24 = vector.shape_cast %23 : vector<1x8x512xf32> to vector<8x512xf32>
    %25 = vector.shape_cast %22 : vector<8x512xf32> to vector<1x8x512xf32>
    tpu.vector_store %arg4[%c0_11, %c0_12, %c0_13], %25 {strides = array<i32>} : memref<1x8x512xf32, #tpu.memory_space<vmem>>, vector<1x8x512xf32>,
    return
  }
  func.func @transform_0(%arg0: i32, %arg1: i32) -> (i32, i32) {
    %c1_i32 = arith.constant 1 : i32
    %0 = arith.muli %arg0, %c1_i32 : i32
    %1 = arith.addi %0, %arg1 : i32
    %c0_i32 = arith.constant 0 : i32
    %c0_i32_0 = arith.constant 0 : i32
    return %1, %c0_i32 : i32, i32
  }
  func.func @transform_1(%arg0: i32, %arg1: i32) -> (i32, i32) {
    %c1_i32 = arith.constant 1 : i32
    %0 = arith.muli %arg0, %c1_i32 : i32
    %1 = arith.addi %0, %arg1 : i32
    %c0_i32 = arith.constant 0 : i32
    %c0_i32_0 = arith.constant 0 : i32
    return %1, %c0_i32 : i32, i32
  }
  func.func @transform_2(%arg0: i32, %arg1: i32) -> (i32, i32, i32) {
    %c0_i32 = arith.constant 0 : i32
    %c0_i32_0 = arith.constant 0 : i32
    %c0_i32_1 = arith.constant 0 : i32
    return %arg0, %c0_i32, %c0_i32_0 : i32, i32, i32
  }
}

</mosaic_0001>

<bundles_post_ra>
// kernel: ae_loss.1
= control target key start
LH: loop header
LB: loop body
LE: loop exit
PB: predicated region body
PF: predicated region fallthrough
CT: control target
= control target key end

     0   :  { %s437_s9 = smov 0   ;;  %s439_s10 = smov 0   ;;  %s478_s0 = inlined_call_operand.vmem [shape: f32[16,512], index: 0, kind: input, shape index: {}]   ;;  %s479_s1 = inlined_call_operand.vmem [shape: f32[16,512], index: 1, kind: input, shape index: {}]   ;;  %s480_s2 = inlined_call_operand.vmem [shape: f32[2,8,512], index: 2, kind: output, shape index: {}]  }
   0x1   :  { %s441_s11 = smov 0  }
   0x2 LB: > { %s24_s12 = sadd.s32 1, %s416_s10  ;;  %p345_p0 = scmp.ge.s32.totalorder %s420_s11, 1  ;;  %s420_s11 = sphi %s441_s11, %s12_s11   ;;  %s416_s10 = sphi %s439_s10, %s482_s10   ;;  %s412_s9 = sphi %s437_s9, %s481_s9  }
   0x3   : > { %p26_p1 = scmp.ge.s32.totalorder %s24_s12, 2  ;;  %p142_p2 = scmp.lt.s32.totalorder %s420_s11, 3 }
   0x5   : > { %s484_s12 = smov (%p26_p1, %s24_s12), 0  ;;  %p143_p3 = pnand %p345_p0, %p142_p2 }
   0x6   : > { %p172_p4 = scmp.lt.s32.totalorder (!%p143_p3), %s412_s9, 1 }
   0x7   : > { %146 = sbr.rel (%p143_p3) target bundleno = 49 (0x31), region = 28 }
   0xe   : > { %s486_s9 = smov (!%p172_p4, %s412_s9), 1 }
   0xf   : > { %s455_s13 = sshll.u32 %s486_s9, 5 }
  0x10   : > { %s176_s16 = scalar_lea.vmem %s478_s0, %s455_s13  ;;  %s183_s19 = scalar_lea.vmem %s479_s1, %s455_s13 }
  0x11   : > { %v190_v0 = vld [vmem:[%s176_s16] sm:$0xff]  ;;  %v191_v1 = vld [vmem:[%s176_s16 + $0x8] sm:$0xff]  ;;  %v192_v2 = vld [vmem:[%s176_s16 + $0x10] sm:$0xff]  ;;  %s189_s22 = scalar_lea.vmem %s480_s2, %s455_s13 }
  0x12   : > { %382 = vlog2.f32 %v190_v0  ;;  %v210_v3 = vsub.f32 1.0, %v190_v0  ;;  %v211_v4 = vsub.f32 1.0, %v191_v1  ;;  %v212_v5 = vsub.f32 1.0, %v192_v2  ;;  %v193_v6 = vld [vmem:[%s176_s16 + $0x18] sm:$0xff]  ;;  %v194_v23 = vld [vmem:[%s183_s19] sm:$0xff]  ;;  %v195_v28 = vld [vmem:[%s183_s19 + $0x8] sm:$0xff] }
  0x13   : > { %384 = vlog2.f32 %v191_v1  ;;  %v213_v7 = vsub.f32 1.0, %v193_v6  ;;  %v196_v35 = vld [vmem:[%s183_s19 + $0x10] sm:$0xff]  ;;  %v197_v41 = vld [vmem:[%s183_s19 + $0x18] sm:$0xff] }
  0x14   : > { %386 = vlog2.f32 %v210_v3 }
  0x15   : > { %388 = vlog2.f32 %v211_v4 }
  0x16   : > { %390 = vlog2.f32 %v192_v2 }
  0x17   : > { %392 = vlog2.f32 %v212_v5 }
  0x18   : > { %394 = vlog2.f32 %v193_v6 }
  0x19   : > { %396 = vlog2.f32 %v213_v7 }
  0x1c   : > { %v383_v8 = vpop.eup %382 }
  0x1d   : > { %v385_v9 = vpop.eup %384  ;;  %v199_v10 = vmul.f32 0.6931472, %v383_v8 }
  0x1e   : > { %v387_v11 = vpop.eup %386  ;;  %v201_v12 = vmul.f32 0.6931472, %v385_v9 }
  0x1f   : > { %v389_v13 = vpop.eup %388  ;;  %v206_v14 = vmax.f32 %v199_v10, -100.0  ;;  %v215_v15 = vmul.f32 0.6931472, %v387_v11 }
  0x20   : > { %v391_v16 = vpop.eup %390  ;;  %v207_v17 = vmax.f32 %v201_v12, -100.0  ;;  %v217_v18 = vmul.f32 0.6931472, %v389_v13 }
  0x21   : > { %v393_v19 = vpop.eup %392  ;;  %v222_v20 = vmax.f32 %v215_v15, -100.0  ;;  %v203_v21 = vmul.f32 0.6931472, %v391_v16 }
  0x22   : > { %v395_v22 = vpop.eup %394  ;;  %v223_v24 = vmax.f32 %v217_v18, -100.0  ;;  %v219_v25 = vmul.f32 0.6931472, %v393_v19 }
  0x23   : > { %v397_v26 = vpop.eup %396  ;;  %v226_v27 = vsub.f32 %v206_v14, %v222_v20  ;;  %v208_v29 = vmax.f32 %v203_v21, -100.0  ;;  %v205_v30 = vmul.f32 0.6931472, %v395_v22 }
  0x24   : > { %v227_v31 = vsub.f32 %v207_v17, %v223_v24  ;;  %v224_v32 = vmax.f32 %v219_v25, -100.0  ;;  %v221_v33 = vmul.f32 0.6931472, %v397_v26 }
  0x25   : > { %v230_v34 = vmul.f32 %v226_v27, %v194_v23  ;;  %v209_v36 = vmax.f32 %v205_v30, -100.0 }
  0x26   : > { %v231_v37 = vmul.f32 %v227_v31, %v195_v28  ;;  %v228_v38 = vsub.f32 %v208_v29, %v224_v32  ;;  %v225_v39 = vmax.f32 %v221_v33, -100.0 }
  0x27   : > { %v234_v40 = vadd.f32 %v230_v34, %v222_v20 }
  0x28   : > { %v235_v42 = vadd.f32 %v231_v37, %v223_v24  ;;  %v232_v43 = vmul.f32 %v228_v38, %v196_v35  ;;  %v229_v44 = vsub.f32 %v209_v36, %v225_v39 }
  0x29   : > { %v238_v45 = vsub.f32 0.0, %v234_v40 }
  0x2a   : > { %v239_v46 = vsub.f32 0.0, %v235_v42  ;;  %v236_v47 = vadd.f32 %v232_v43, %v224_v32  ;;  %v233_v48 = vmul.f32 %v229_v44, %v197_v41 }
  0x2b   : > { %262 = vst [vmem:[%s189_s22] sm:$0xff] %v238_v45 }
  0x2c   : > { %v240_v49 = vsub.f32 0.0, %v236_v47  ;;  %v237_v50 = vadd.f32 %v233_v48, %v225_v39  ;;  %263 = vst [vmem:[%s189_s22 + $0x8] sm:$0xff] %v239_v46 }
  0x2e   : > { %v241_v51 = vsub.f32 0.0, %v237_v50  ;;  %264 = vst [vmem:[%s189_s22 + $0x10] sm:$0xff] %v240_v49 }
  0x30   : > { %265 = vst [vmem:[%s189_s22 + $0x18] sm:$0xff] %v241_v51 }
  0x31 PF: > { %s12_s11 = sadd.s32 1, %s420_s11   ;;  %s481_s9 = smov %s416_s10 }
  0x32   : > { %p9_p5 = scmp.ge.s32.totalorder %s12_s11, 4   ;;  %s482_s10 = smov %s484_s12 }
  0x34   :  { %11 = sbr.rel (!%p9_p5) target bundleno = 2 (0x2), region = 65 }

</bundles_post_ra>
